<compile_context>
chip_gen: v5e
topology: v5e:2x2
jax: 0.10.0
libtpu: 0.0.40
codegen_flags: <defaults>
</compile_context>

<pallas_src>
import functools

import jax
import jax.numpy as jnp
from jax import lax
from jax.experimental import pallas as pl
from jax.experimental.pallas import tpu as pltpu

LANE = 128
_MIB = 1024 * 1024


def _round_up(x, m):
    return ((x + m - 1) // m) * m


def _sublane_granule(dtype):
    """Packed-sublane granularity: 8 rows/vreg for 32-bit, 16 for bf16, 32 for int8."""
    itemsize = jnp.dtype(dtype).itemsize
    return 8 * max(1, 4 // itemsize)


def _padded_block_bytes(shape_2d, dtype):
    """Physical VMEM footprint of a 2-D block after (sublane, 128-lane) tiling/padding."""
    r, c = shape_2d
    itemsize = jnp.dtype(dtype).itemsize
    return _round_up(r, _sublane_granule(dtype)) * _round_up(c, LANE) * itemsize


def _gemm_bias_lrelu_kernel(x_ref, w_ref, b_ref, o_ref, *, slope):
    # x_ref : (tile_m, K_pad)   im2col rows for this tile (compute dtype)
    # w_ref : (K_pad, tile_n)   folded conv weights (compute dtype)
    # b_ref : (1, tile_n)       bias (f32)
    # o_ref : (tile_m, tile_n)  output tile
    acc = jnp.dot(x_ref[...], w_ref[...], preferred_element_type=jnp.float32)
    acc = acc + b_ref[...]
    # LeakyReLU(slope), 0 < slope < 1: one vmul + vmax instead of vcmp+vmul+vsel.
    o_ref[...] = jnp.maximum(acc, slope * acc).astype(o_ref.dtype)


def conv_block_nhwc(x_nhwc, w_hwio, bias, *, slope=0.05, tile_m=1024,
                    compute_dtype=jnp.bfloat16, min_grid_steps=4,
                    weight_vmem_budget=8 * _MIB):
    """Conv2d(k=3, s=1, p=1) + LeakyReLU(slope). NHWC activations / HWIO weights."""
    N, H, W, Cin = x_nhwc.shape
    Cout = w_hwio.shape[-1]
    out_dtype = x_nhwc.dtype
    if compute_dtype is None:
        compute_dtype = x_nhwc.dtype
    gran = _sublane_granule(compute_dtype)

    # ---- XLA glue: im2col, folding all 9 taps into the contraction dim (K = 9*Cin). ----
    # Cast to the compute dtype FIRST so the materialized patches buffer is narrow.
    xc = x_nhwc.astype(compute_dtype)
    x_pad = jnp.pad(xc, ((0, 0), (1, 1), (1, 1), (0, 0)))
    cols = [x_pad[:, kh:kh + H, kw:kw + W, :] for kh in range(3) for kw in range(3)]
    patches = jnp.concatenate(cols, axis=-1)               # (N, H, W, 9*Cin)
    K = 9 * Cin
    lhs = patches.reshape(N * H * W, K)                    # (M, K)
    w_mat = w_hwio.reshape(K, Cout).astype(compute_dtype)  # same (kh, kw, c) ordering

    # Pad K to the packed-sublane granularity of the compute dtype (zero rows: neutral).
    K_pad = _round_up(K, gran)
    if K_pad != K:
        lhs = jnp.pad(lhs, ((0, 0), (0, K_pad - K)))
        w_mat = jnp.pad(w_mat, ((0, K_pad - K), (0, 0)))

    # Output channels: only pad to a 128-lane multiple when Cout >= 128 (lane-dense
    # unmasked stores at <2x waste).  For small Cout (the DQN case) keep the exact
    # channel count — padding 8 -> 128 would multiply output HBM write bytes by 16x.
    Cout_pad = _round_up(Cout, LANE) if Cout >= LANE else Cout
    if Cout_pad != Cout:
        w_mat = jnp.pad(w_mat, ((0, 0), (0, Cout_pad - Cout)))
        bias = jnp.pad(bias, (0, Cout_pad - Cout))
    bias2d = bias.astype(jnp.float32).reshape(1, Cout_pad)

    # Tile Cout only if keeping the whole folded weight block resident would blow VMEM.
    if (Cout_pad % LANE == 0
            and _padded_block_bytes((K_pad, Cout_pad), compute_dtype) > weight_vmem_budget):
        tile_n = 256 if Cout_pad % 256 == 0 else LANE
    else:
        tile_n = Cout_pad

    # Row tile: as large as practical (amortizes ~0.35us/step grid overhead), rounded to
    # the packed granularity, capped so the grid keeps >= min_grid_steps parallel steps
    # (v7x has two TensorCores; a single-step grid would idle one of them).
    M = N * H * W
    cap = max(gran, _round_up((M + min_grid_steps - 1) // min_grid_steps, gran))
    tile_m = max(gran, min(_round_up(tile_m, gran), cap, _round_up(M, gran)))
    M_pad = _round_up(M, tile_m)
    if M_pad != M:
        lhs = jnp.pad(lhs, ((0, M_pad - M), (0, 0)))

    grid = (M_pad // tile_m, Cout_pad // tile_n)

    # Right-size the VMEM request: double-buffered lane-padded blocks + headroom
    # (NOT the full 64 MiB physical VMEM of a v7x TensorCore).
    need = (2 * _padded_block_bytes((tile_m, K_pad), compute_dtype)
            + 2 * _padded_block_bytes((tile_m, tile_n), out_dtype)
            + 2 * _padded_block_bytes((K_pad, tile_n), compute_dtype)
            + 2 * _padded_block_bytes((1, tile_n), jnp.float32))
    vmem_limit = int(min(max(need + 8 * _MIB, 16 * _MIB), 56 * _MIB))

    kernel = functools.partial(_gemm_bias_lrelu_kernel, slope=slope)
    out2d = pl.pallas_call(
        kernel,
        out_shape=jax.ShapeDtypeStruct((M_pad, Cout_pad), out_dtype),
        grid_spec=pltpu.PrefetchScalarGridSpec(
            num_scalar_prefetch=0,
            grid=grid,
            in_specs=[
                pl.BlockSpec((tile_m, K_pad), lambda i, j: (i, 0)),   # im2col rows
                pl.BlockSpec((K_pad, tile_n), lambda i, j: (0, j)),   # folded weights
                pl.BlockSpec((1, tile_n), lambda i, j: (0, j)),       # bias
            ],
            out_specs=pl.BlockSpec((tile_m, tile_n), lambda i, j: (i, j)),
        ),
        compiler_params=pltpu.CompilerParams(
            dimension_semantics=("parallel", "parallel"),
            vmem_limit_bytes=vmem_limit,
        ),
    )(lhs, w_mat, bias2d)

    if M_pad != M or Cout_pad != Cout:
        out2d = out2d[:M, :Cout]
    return out2d.reshape(N, H, W, Cout)


def conv_block_nchw(x_nchw, w_oihw, bias, *, slope=0.05, tile_m=1024,
                    compute_dtype=jnp.bfloat16):
    """Matches the PyTorch ConvBlock interface exactly: NCHW activations, OIHW weights."""
    x_nhwc = jnp.transpose(x_nchw, (0, 2, 3, 1))
    w_hwio = jnp.transpose(w_oihw, (2, 3, 1, 0))
    out_nhwc = conv_block_nhwc(x_nhwc, w_hwio, bias, slope=slope, tile_m=tile_m,
                               compute_dtype=compute_dtype)
    return jnp.transpose(out_nhwc, (0, 3, 1, 2))


if __name__ == "__main__":
    # ConvBlock(in_channels=4, out_channels=8) on a small NCHW batch, like the PyTorch spec.
    N, Cin, H, W, Cout = 2, 4, 16, 16, 8

    key = jax.random.PRNGKey(0)
    kx, kw, kb = jax.random.split(key, 3)
    x = jax.random.normal(kx, (N, Cin, H, W), dtype=jnp.float32)            # NCHW
    w = jax.random.normal(kw, (Cout, Cin, 3, 3), dtype=jnp.float32) * 0.1   # OIHW
    b = jax.random.normal(kb, (Cout,), dtype=jnp.float32) * 0.1

    out = conv_block_nchw(x, w, b)   # default path: bf16 matmul inputs, f32 accumulate
    out = jax.block_until_ready(out)
    assert out.shape == (N, Cout, H, W)

    # Reference: XLA conv in the same NCHW/OIHW layout as torch, + bias + LeakyReLU(0.05).
    ref = lax.conv_general_dilated(
        x, w, window_strides=(1, 1), padding=((1, 1), (1, 1)),
        dimension_numbers=("NCHW", "OIHW", "NCHW"),
    ) + b[None, :, None, None]
    ref = jnp.maximum(ref, 0.05 * ref)
    # bf16 matmul inputs (f32 accumulate/epilogue) => loose tolerance vs the f32 reference.
    assert jnp.allclose(out, ref, atol=3e-2, rtol=3e-2), "mismatch vs reference"

    print("KERNEL_OK")
</pallas_src>

<mosaic_0001>
module attributes {stable_mosaic.version = 11 : i64} {
  func.func @_gemm_bias_lrelu_kernel(%arg0: i32, %arg1: i32, %arg2: memref<128x48xbf16, #tpu.memory_space<vmem>>, %arg3: memref<48x8xbf16, #tpu.memory_space<vmem>>, %arg4: memref<1x8xf32, #tpu.memory_space<vmem>>, %arg5: memref<128x8xf32, #tpu.memory_space<vmem>>) attributes {dimension_semantics = [#tpu.dimension_semantics<parallel>, #tpu.dimension_semantics<parallel>], iteration_bounds = array<i64: 4, 1>, scalar_prefetch = 0 : i64, scratch_operands = 0 : i64, tpu.core_type = #tpu.core_type<tc>, window_params = [{transform_indices = @transform_0, window_bounds = array<i64: 128, 48>}, {transform_indices = @transform_1, window_bounds = array<i64: 48, 8>}, {transform_indices = @transform_2, window_bounds = array<i64: 1, 8>}, {transform_indices = @transform_3, window_bounds = array<i64: 128, 8>}]} {
    %c0 = arith.constant 0 : index
    %c0_0 = arith.constant 0 : index
    %0 = vector.load %arg2[%c0, %c0_0] : memref<128x48xbf16, #tpu.memory_space<vmem>>, vector<128x48xbf16>
    %c0_1 = arith.constant 0 : index
    %c0_2 = arith.constant 0 : index
    %1 = vector.load %arg3[%c0_1, %c0_2] : memref<48x8xbf16, #tpu.memory_space<vmem>>, vector<48x8xbf16>
    %cst = arith.constant dense<0.000000e+00> : vector<128x8xf32>
    %2 = tpu.matmul %0, %1, %cst {dimension_numbers = #tpu.dot_dimension_numbers<[1], [0], [0], [1], [0, 0, 1, 1], [], []>} : vector<128x48xbf16>, vector<48x8xbf16>, vector<128x8xf32> -> vector<128x8xf32>
    %c0_3 = arith.constant 0 : index
    %c0_4 = arith.constant 0 : index
    %3 = vector.load %arg4[%c0_3, %c0_4] : memref<1x8xf32, #tpu.memory_space<vmem>>, vector<1x8xf32>
    %4 = vector.broadcast %3 : vector<1x8xf32> to vector<128x8xf32>
    %5 = arith.addf %2, %4 : vector<128x8xf32>
    %cst_5 = arith.constant 5.000000e-02 : f32
    %6 = vector.broadcast %cst_5 : f32 to vector<128x8xf32>
    %7 = arith.mulf %6, %5 : vector<128x8xf32>
    %8 = arith.maximumf %5, %7 : vector<128x8xf32>
    %c0_6 = arith.constant 0 : index
    %c0_7 = arith.constant 0 : index
    %9 = vector.load %arg5[%c0_6, %c0_7] : memref<128x8xf32, #tpu.memory_space<vmem>>, vector<128x8xf32>
    tpu.vector_store %arg5[%c0_6, %c0_7], %8 {strides = array<i32>} : memref<128x8xf32, #tpu.memory_space<vmem>>, vector<128x8xf32>,
    return
  }
  func.func @transform_0(%arg0: i32, %arg1: i32) -> (i32, i32) {
    %c0_i32 = arith.constant 0 : i32
    %c0_i32_0 = arith.constant 0 : i32
    return %arg0, %c0_i32 : i32, i32
  }
  func.func @transform_1(%arg0: i32, %arg1: i32) -> (i32, i32) {
    %c0_i32 = arith.constant 0 : i32
    %c0_i32_0 = arith.constant 0 : i32
    return %c0_i32, %arg1 : i32, i32
  }
  func.func @transform_2(%arg0: i32, %arg1: i32) -> (i32, i32) {
    %c0_i32 = arith.constant 0 : i32
    %c0_i32_0 = arith.constant 0 : i32
    return %c0_i32, %arg1 : i32, i32
  }
  func.func @transform_3(%arg0: i32, %arg1: i32) -> (i32, i32) {
    %c0_i32 = arith.constant 0 : i32
    return %arg0, %arg1 : i32, i32
  }
}

</mosaic_0001>

<bundles_post_ra>
// kernel: tpu_custom_call.1
= control target key start
LH: loop header
LB: loop body
LE: loop exit
PB: predicated region body
PF: predicated region fallthrough
CT: control target
= control target key end

     0   :  { %s689_s12 = smov 0   ;;  %s691_s13 = smov 0   ;;  %s798_s0 = inlined_call_operand.vmem [shape: bf16[512,48], index: 0, kind: input, shape index: {}]   ;;  %s799_s1 = inlined_call_operand.vmem [shape: bf16[48,8], index: 1, kind: input, shape index: {}]   ;;  %s800_s2 = inlined_call_operand.vmem [shape: f32[1,8], index: 2, kind: input, shape index: {}]   ;;  %s801_s3 = inlined_call_operand.vmem [shape: f32[512,8], index: 3, kind: output, shape index: {}]  }
   0x1   :  { %s693_s14 = smov 0  }
   0x2 LB: > { %s25_s15 = sadd.s32 1, %s663_s13  ;;  %p541_p0 = scmp.ge.s32.totalorder %s667_s14, 1  ;;  %s667_s14 = sphi %s693_s14, %s13_s14   ;;  %s663_s13 = sphi %s691_s13, %s803_s13   ;;  %s659_s12 = sphi %s689_s12, %s802_s12  }
   0x3   : > { %p27_p1 = scmp.ge.s32.totalorder %s25_s15, 4  ;;  %p169_p2 = scmp.lt.s32.totalorder %s667_s14, 5 }
   0x5   : > { %s805_s15 = smov (%p27_p1, %s25_s15), 0  ;;  %p170_p3 = pnand %p541_p0, %p169_p2 }
   0x6   : > { %s542_s18 = sshll.u32 (!%p170_p3), %s659_s12, 4 }
   0x7   : > { %173 = sbr.rel (%p170_p3) target bundleno = 189 (0xbd), region = 32  ;;  %p204_p4 = scmp.lt.s32.totalorder (!%p170_p3), %s542_s18, 63 }
   0xc   : > { %v610_v0 = vld [vmem:[%s799_s1 + $0x10] sm:$0xff]  ;;  %v609_v1 = vld [vmem:[%s799_s1 + $0x8] sm:$0xff]  ;;  %s807_s18 = smov (!%p204_p4, %s542_s18), 63  ;;  %v608_v2 = vld [vmem:[%s799_s1] sm:$0xff]  ;;  %vm310_vm0 = vcmask 392192   ;;  %vm416_vm1 = vcmask 64512  }
   0xd   : > { %340 = vmatpush.bf16.msra.mxu0 %v610_v0  ;;  %611 = vmatpush.bf16.msra.mxu1 %v610_v0  ;;  %s543_s21 = sshll.u32 %s807_s18, 2  ;;  %v733_v11 = vld [vmem:[%s800_s2] ss:$0 sm:$0xff]  ;;  %s545_s29 = sshll.u32 %s807_s18, 3 }
   0xe   : > { %612 = vmatpush.bf16.msra.mxu2 %v610_v0  ;;  %613 = vmatpush.bf16.msra.mxu3 %v610_v0  ;;  %s207_s26 = scalar_lea.vmem %s798_s0, %s543_s21  ;;  %s741_s5 = scalar_lea.vmem %s801_s3, %s545_s29 }
   0xf   : > { %v600_v3 = vld [vmem:[%s207_s26] sm:$0xff]  ;;  %v602_v4 = vld [vmem:[%s207_s26 + $0x10] sm:$0xff]  ;;  %v601_v7 = vld [vmem:[%s207_s26 + $0x8] sm:$0xff] }
  0x10   : > { %v604_v5 = vld [vmem:[%s207_s26 + $0x20] sm:$0xff]  ;;  %v606_v6 = vld [vmem:[%s207_s26 + $0x30] sm:$0xff]  ;;  %v603_v8 = vld [vmem:[%s207_s26 + $0x18] sm:$0xff] }
  0x11   : > { %341 = vmatpush.bf16.msra.mxu0 %v609_v1  ;;  %614 = vmatpush.bf16.msra.mxu1 %v609_v1  ;;  %v605_v9 = vld [vmem:[%s207_s26 + $0x28] sm:$0xff]  ;;  %v607_v10 = vld [vmem:[%s207_s26 + $0x38] sm:$0xff] }
  0x12   : > { %615 = vmatpush.bf16.msra.mxu2 %v609_v1  ;;  %616 = vmatpush.bf16.msra.mxu3 %v609_v1 }
  0x15   : > { %342 = vmatpush.bf16.msra.mxu0 %v608_v2  ;;  %617 = vmatpush.bf16.msra.mxu1 %v608_v2 }
  0x16   : > { %618 = vmatpush.bf16.msra.mxu2 %v608_v2  ;;  %619 = vmatpush.bf16.msra.mxu3 %v608_v2 }
  0x18   : > { %590 = vmatmul.msk.bf16.vlgmr.msra.gmra.mxu0 %vm310_vm0, %v600_v3  ;;  %592 = vmatmul.msk.bf16.vlgmr.msra.gmra.mxu1 %vm310_vm0, %v602_v4 }
  0x19   : > { %594 = vmatmul.msk.bf16.vlgmr.msra.gmra.mxu2 %vm310_vm0, %v604_v5  ;;  %596 = vmatmul.msk.bf16.vlgmr.msra.gmra.mxu3 %vm310_vm0, %v606_v6 }
  0x28   : > { %591 = vmatmul.msk.bf16.gmra.mxu0 %vm310_vm0, %v601_v7  ;;  %593 = vmatmul.msk.bf16.gmra.mxu1 %vm310_vm0, %v603_v8 }
  0x29   : > { %595 = vmatmul.msk.bf16.gmra.mxu2 %vm310_vm0, %v605_v9  ;;  %597 = vmatmul.msk.bf16.gmra.mxu3 %vm310_vm0, %v607_v10 }
  0x95   : > { %v344_v12 = vpop.f32.mrf.mxu0  ;;  %v354_v13 = vpop.f32.mrf.mxu1 }
  0x96   : > { %v345_v14 = vadd.f32 %v733_v11, %v344_v12  ;;  %v355_v15 = vadd.f32 %v733_v11, %v354_v13 }
  0x98   : > { %v384_v16 = vmul.f32 0.05, %v345_v14  ;;  %v388_v17 = vmul.f32 0.05, %v355_v15 }
  0x9a   : > { %v400_v18 = vmax.f32 %v345_v14, %v384_v16  ;;  %v404_v19 = vmax.f32 %v355_v15, %v388_v17 }
  0x9c   : > { %417 = vst.msk [vmem:[%s741_s5] sm:$0xff] %vm416_vm1, %v400_v18  ;;  %v364_v20 = vpop.f32.mrf.mxu2  ;;  %v374_v21 = vpop.f32.mrf.mxu3 }
  0x9d   : > { %421 = vst.msk [vmem:[%s741_s5 + $0x20] sm:$0xff] %vm416_vm1, %v404_v19  ;;  %v365_v22 = vadd.f32 %v733_v11, %v364_v20  ;;  %v375_v23 = vadd.f32 %v733_v11, %v374_v21  ;;  %v346_v24 = vpop.f32.mrf.mxu0  ;;  %v356_v25 = vpop.f32.mrf.mxu1 }
  0x9e   : > { %v347_v26 = vadd.f32 %v733_v11, %v346_v24  ;;  %v357_v27 = vadd.f32 %v733_v11, %v356_v25 }
  0x9f   : > { %v392_v28 = vmul.f32 0.05, %v365_v22  ;;  %v396_v29 = vmul.f32 0.05, %v375_v23 }
  0xa0   : > { %v385_v30 = vmul.f32 0.05, %v347_v26  ;;  %v389_v31 = vmul.f32 0.05, %v357_v27 }
  0xa1   : > { %v408_v32 = vmax.f32 %v365_v22, %v392_v28  ;;  %v412_v33 = vmax.f32 %v375_v23, %v396_v29 }
  0xa2   : > { %v401_v34 = vmax.f32 %v347_v26, %v385_v30  ;;  %v405_v35 = vmax.f32 %v357_v27, %v389_v31 }
  0xa3   : > { %425 = vst.msk [vmem:[%s741_s5 + $0x40] sm:$0xff] %vm416_vm1, %v408_v32 }
  0xa4   : > { %429 = vst.msk [vmem:[%s741_s5 + $0x60] sm:$0xff] %vm416_vm1, %v412_v33  ;;  %v366_v36 = vpop.f32.mrf.mxu2  ;;  %v376_v37 = vpop.f32.mrf.mxu3 }
  0xa5   : > { %418 = vst.msk [vmem:[%s741_s5 + $0x8] sm:$0xff] %vm416_vm1, %v401_v34  ;;  %v367_v38 = vadd.f32 %v733_v11, %v366_v36  ;;  %v377_v39 = vadd.f32 %v733_v11, %v376_v37  ;;  %v349_v40 = vpop.f32.mrf.mxu0  ;;  %v359_v41 = vpop.f32.mrf.mxu1 }
  0xa6   : > { %422 = vst.msk [vmem:[%s741_s5 + $0x28] sm:$0xff] %vm416_vm1, %v405_v35  ;;  %v350_v42 = vadd.f32 %v733_v11, %v349_v40  ;;  %v360_v43 = vadd.f32 %v733_v11, %v359_v41 }
  0xa7   : > { %v393_v44 = vmul.f32 0.05, %v367_v38  ;;  %v397_v45 = vmul.f32 0.05, %v377_v39 }
  0xa8   : > { %v386_v46 = vmul.f32 0.05, %v350_v42  ;;  %v390_v47 = vmul.f32 0.05, %v360_v43 }
  0xa9   : > { %v409_v48 = vmax.f32 %v367_v38, %v393_v44  ;;  %v413_v49 = vmax.f32 %v377_v39, %v397_v45 }
  0xaa   : > { %v402_v50 = vmax.f32 %v350_v42, %v386_v46  ;;  %v406_v51 = vmax.f32 %v360_v43, %v390_v47 }
  0xab   : > { %426 = vst.msk [vmem:[%s741_s5 + $0x48] sm:$0xff] %vm416_vm1, %v409_v48 }
  0xac   : > { %430 = vst.msk [vmem:[%s741_s5 + $0x68] sm:$0xff] %vm416_vm1, %v413_v49  ;;  %v369_v52 = vpop.f32.mrf.mxu2  ;;  %v379_v53 = vpop.f32.mrf.mxu3 }
  0xad   : > { %419 = vst.msk [vmem:[%s741_s5 + $0x10] sm:$0xff] %vm416_vm1, %v402_v50  ;;  %v370_v54 = vadd.f32 %v733_v11, %v369_v52  ;;  %v380_v55 = vadd.f32 %v733_v11, %v379_v53  ;;  %v351_v56 = vpop.f32.mrf.mxu0  ;;  %v361_v57 = vpop.f32.mrf.mxu1 }
  0xae   : > { %423 = vst.msk [vmem:[%s741_s5 + $0x30] sm:$0xff] %vm416_vm1, %v406_v51  ;;  %v352_v58 = vadd.f32 %v733_v11, %v351_v56  ;;  %v362_v59 = vadd.f32 %v733_v11, %v361_v57 }
  0xaf   : > { %v394_v60 = vmul.f32 0.05, %v370_v54  ;;  %v398_v61 = vmul.f32 0.05, %v380_v55 }
  0xb0   : > { %v387_v62 = vmul.f32 0.05, %v352_v58  ;;  %v391_v63 = vmul.f32 0.05, %v362_v59 }
  0xb1   : > { %v410_v0 = vmax.f32 %v370_v54, %v394_v60  ;;  %v414_v1 = vmax.f32 %v380_v55, %v398_v61 }
  0xb2   : > { %v403_v2 = vmax.f32 %v352_v58, %v387_v62  ;;  %v407_v3 = vmax.f32 %v362_v59, %v391_v63 }
  0xb3   : > { %427 = vst.msk [vmem:[%s741_s5 + $0x50] sm:$0xff] %vm416_vm1, %v410_v0 }
  0xb4   : > { %431 = vst.msk [vmem:[%s741_s5 + $0x70] sm:$0xff] %vm416_vm1, %v414_v1  ;;  %v371_v4 = vpop.f32.mrf.mxu2  ;;  %v381_v5 = vpop.f32.mrf.mxu3 }
  0xb5   : > { %420 = vst.msk [vmem:[%s741_s5 + $0x18] sm:$0xff] %vm416_vm1, %v403_v2  ;;  %v372_v6 = vadd.f32 %v733_v11, %v371_v4  ;;  %v382_v7 = vadd.f32 %v733_v11, %v381_v5 }
  0xb6   : > { %424 = vst.msk [vmem:[%s741_s5 + $0x38] sm:$0xff] %vm416_vm1, %v407_v3 }
  0xb7   : > { %v395_v8 = vmul.f32 0.05, %v372_v6  ;;  %v399_v9 = vmul.f32 0.05, %v382_v7 }
  0xb9   : > { %v411_v10 = vmax.f32 %v372_v6, %v395_v8  ;;  %v415_v12 = vmax.f32 %v382_v7, %v399_v9 }
  0xbb   : > { %428 = vst.msk [vmem:[%s741_s5 + $0x58] sm:$0xff] %vm416_vm1, %v411_v10 }
  0xbc   : > { %432 = vst.msk [vmem:[%s741_s5 + $0x78] sm:$0xff] %vm416_vm1, %v415_v12 }
  0xbd PF: > { %s13_s14 = sadd.s32 1, %s667_s14   ;;  %s802_s12 = smov %s663_s13 }
  0xbe   : > { %p10_p5 = scmp.ge.s32.totalorder %s13_s14, 6   ;;  %s803_s13 = smov %s805_s15 }
  0xc0   :  { %12 = sbr.rel (!%p10_p5) target bundleno = 2 (0x2), region = 68 }

</bundles_post_ra>
